<compile_context>
chip_gen: v7x
topology: tpu7x:2x2x1
jax: 0.10.0
libtpu: 0.0.40
codegen_flags: <defaults>
</compile_context>

<pallas_src>
import functools

import jax
import jax.numpy as jnp
from jax import lax
from jax.experimental import pallas as pl
from jax.experimental.pallas import tpu as pltpu


_COSINE_EPS = 1e-8      # torch.nn.CosineSimilarity default eps
_EUCLIDEAN_EPS = 1e-6   # torch.nn.PairwiseDistance default eps


def _make_pair_metric_kernel(d, metric, eps):
    """Kernel computing the per-pair metric over a (tile_pairs, 2*d) block."""

    def kernel(x_ref, o_ref):
        # Slice the Ref first, cast per-half (no full-block f32 temporary).
        g1 = x_ref[:, :d].astype(jnp.float32)      # even rows of the original x
        g2 = x_ref[:, d:].astype(jnp.float32)      # odd rows of the original x
        if metric == "cosine":
            s12 = jnp.sum(g1 * g2, axis=-1)
            n1sq = jnp.sum(g1 * g1, axis=-1)
            n2sq = jnp.sum(g2 * g2, axis=-1)
            # torch: x1.x2 / max(||x1||*||x2||, eps)  ==  s12 * rsqrt(max(n1sq*n2sq, eps^2))
            res = s12 * lax.rsqrt(jnp.maximum(n1sq * n2sq, eps * eps))
        else:  # 'euclidean' == nn.PairwiseDistance(p=2): ||g1 - g2 + eps||_2
            diff = (g1 - g2) + eps
            res = jnp.sqrt(jnp.sum(diff * diff, axis=-1))
        # (tile_pairs,) -> lane-dense (1, tile_pairs) store.
        o_ref[...] = res.reshape(1, -1).astype(o_ref.dtype)

    return kernel


def _default_tile_pairs(num_pairs, d, itemsize, budget_bytes=8 << 20):
    """Byte-budgeted row tile.

    Returns either num_pairs (single full block) or a multiple of 128 so both
    the (tile, 2*d) input block and the lane-dense (1, tile) output block are
    legal under the (8, 128) constraint.
    """
    bytes_per_pair = 2 * d * itemsize
    total_bytes = num_pairs * bytes_per_pair
    if total_bytes <= budget_bytes or num_pairs <= 128:
        return num_pairs                                   # one block, one step
    # Largest multiple of 128 that fits the per-block byte budget.
    t = max(128, ((budget_bytes // bytes_per_pair) // 128) * 128)
    # Megacore (v7x): aim for >= 4 grid steps (>= 2 per TensorCore) so each core
    # can double-buffer, but only while blocks stay >= ~2 MiB.
    quarter = -(-num_pairs // 4)
    quarter_128 = max(128, ((quarter + 127) // 128) * 128)
    if quarter_128 < t and quarter_128 * bytes_per_pair >= (2 << 20):
        t = quarter_128
    return min(t, num_pairs)


@functools.partial(jax.jit, static_argnames=("ds_metric", "tile_pairs"))
def gmn_loss_fast_forward(x, *, ds_metric="cosine", tile_pairs=None):
    """GMNLoss_FAST.forward.

    x: [2 * num_pairs, D] with rows interleaved as (g1_0, g2_0, g1_1, g2_1, ...).
    Returns pred_ds of shape [num_pairs] (or x.squeeze() for ds_metric='scalar').
    """
    if ds_metric == "scalar":
        # TODO(synk): the 'scalar' branch's host-side mean-magnitude check with
        # print(...)/exit(1) is host control flow with no Pallas equivalent.
        return jnp.squeeze(x)
    if ds_metric not in ("cosine", "euclidean"):
        raise ValueError(f"unsupported ds_metric: {ds_metric}")

    two_b, d = x.shape
    if two_b % 2 != 0:
        raise ValueError("x must have an even number of rows (interleaved pairs)")
    b = two_b // 2
    eps = _COSINE_EPS if ds_metric == "cosine" else _EUCLIDEAN_EPS
    itemsize = jnp.dtype(x.dtype).itemsize

    # Free (contiguous) reshape: rows 2i and 2i+1 become one lane-dense 2*d row,
    # so x is read exactly once with dense DMAs (no strided gather).
    xp = x.reshape(b, 2 * d)

    if tile_pairs is None:
        tile_pairs = _default_tile_pairs(b, d, itemsize)
    tile_pairs = int(tile_pairs)
    if tile_pairs != b and tile_pairs % 128 != 0:
        raise ValueError("tile_pairs must equal num_pairs or be a multiple of 128")
    grid = (pl.cdiv(b, tile_pairs),)

    kernel = _make_pair_metric_kernel(d, ds_metric, eps)

    # Scheduler hint (per-branch flop/transcendental counts; padded output bytes).
    if ds_metric == "cosine":
        flops = b * (6 * d + 4)
    else:
        flops = b * (4 * d + 1)
    out_padded_bytes = 8 * (pl.cdiv(b, 128) * 128) * itemsize
    cost = pl.CostEstimate(
        flops=flops,
        transcendentals=b,
        bytes_accessed=xp.size * itemsize + out_padded_bytes,
    )

    # Keep double-buffered input blocks well inside scoped VMEM on every chip
    # (v5e default is only 16 MiB; v7x physical VMEM is 64 MiB).
    block_bytes = tile_pairs * 2 * d * itemsize
    vmem_limit = int(max(32 << 20, 2 * block_bytes + (4 << 20)))

    out = pl.pallas_call(
        kernel,
        out_shape=jax.ShapeDtypeStruct((1, b), x.dtype),
        grid_spec=pltpu.PrefetchScalarGridSpec(
            num_scalar_prefetch=0,
            grid=grid,
            in_specs=[pl.BlockSpec((tile_pairs, 2 * d), lambda i: (i, 0))],
            out_specs=pl.BlockSpec((1, tile_pairs), lambda i: (0, i)),
        ),
        compiler_params=pltpu.CompilerParams(
            dimension_semantics=("parallel",),
            vmem_limit_bytes=vmem_limit,
        ),
        cost_estimate=cost,
    )(xp)
    return out[0]


def gmn_loss_fast_reference(x, ds_metric="cosine"):
    """Pure-JAX reference mirroring the PyTorch forward."""
    g1 = x[0::2].astype(jnp.float32)
    g2 = x[1::2].astype(jnp.float32)
    if ds_metric == "cosine":
        n1 = jnp.sqrt(jnp.sum(g1 * g1, axis=1))
        n2 = jnp.sqrt(jnp.sum(g2 * g2, axis=1))
        return jnp.sum(g1 * g2, axis=1) / jnp.maximum(n1 * n2, _COSINE_EPS)
    if ds_metric == "euclidean":
        diff = (g1 - g2) + _EUCLIDEAN_EPS
        return jnp.sqrt(jnp.sum(diff * diff, axis=1))
    return jnp.squeeze(x)


if __name__ == "__main__":
    key = jax.random.PRNGKey(0)
    k1, k2, k3 = jax.random.split(key, 3)

    # Case 1: small shapes consistent with the module (graph-level embeddings,
    # pairs interleaved along rows): 8 pairs, D=32 -> single full block.
    x1 = jax.random.normal(k1, (16, 32), dtype=jnp.float32)
    out1 = jax.block_until_ready(gmn_loss_fast_forward(x1))
    ref1 = gmn_loss_fast_reference(x1)
    assert out1.shape == (8,)
    assert jnp.allclose(out1, ref1, atol=1e-5, rtol=1e-5)

    # Case 2: D=128, 200 pairs with an explicit 128-row tile -> multi-step
    # 'parallel' grid, ragged last tile, lane-dense (1, 128) output blocks.
    x2 = jax.random.normal(k2, (2 * 200, 128), dtype=jnp.float32)
    out2 = jax.block_until_ready(gmn_loss_fast_forward(x2, tile_pairs=128))
    ref2 = gmn_loss_fast_reference(x2)
    assert out2.shape == (200,)
    assert jnp.allclose(out2, ref2, atol=1e-5, rtol=1e-5)

    # Case 3: 'euclidean' metric branch (nn.PairwiseDistance semantics).
    out3 = jax.block_until_ready(gmn_loss_fast_forward(x1, ds_metric="euclidean"))
    ref3 = gmn_loss_fast_reference(x1, ds_metric="euclidean")
    assert jnp.allclose(out3, ref3, atol=1e-5, rtol=1e-5)

    # Case 4: bf16 input passed straight through (in-register f32 accumulation).
    x4 = jax.random.normal(k3, (2 * 136, 64), dtype=jnp.bfloat16)
    out4 = jax.block_until_ready(gmn_loss_fast_forward(x4))
    ref4 = gmn_loss_fast_reference(x4)
    assert out4.shape == (136,)
    assert jnp.allclose(out4.astype(jnp.float32), ref4, atol=2e-2, rtol=2e-2)

    print("KERNEL_OK")
</pallas_src>

<mosaic_0001>
module attributes {stable_mosaic.version = 11 : i64} {
  func.func @kernel(%arg0: i32, %arg1: memref<8x64xf32, #tpu.memory_space<vmem>>, %arg2: memref<1x8xf32, #tpu.memory_space<vmem>>) attributes {dimension_semantics = [#tpu.dimension_semantics<parallel>], iteration_bounds = array<i64: 1>, scalar_prefetch = 0 : i64, scratch_operands = 0 : i64, tpu.core_type = #tpu.core_type<tc>, window_params = [{transform_indices = @transform_0, window_bounds = array<i64: 8, 64>}, {transform_indices = @transform_1, window_bounds = array<i64: 1, 8>}]} {
    %c0 = arith.constant 0 : index
    %c0_0 = arith.constant 0 : index
    %0 = vector.load %arg1[%c0, %c0_0] : memref<8x64xf32, #tpu.memory_space<vmem>>, vector<8x32xf32>
    %c0_1 = arith.constant 0 : index
    %c32 = arith.constant 32 : index
    %1 = vector.load %arg1[%c0_1, %c32] : memref<8x64xf32, #tpu.memory_space<vmem>>, vector<8x32xf32>
    %2 = arith.mulf %0, %1 : vector<8x32xf32>
    %cst = arith.constant dense<0.000000e+00> : vector<8xf32>
    %3 = vector.multi_reduction <add>, %2, %cst [1] : vector<8x32xf32> to vector<8xf32>
    %4 = arith.mulf %0, %0 : vector<8x32xf32>
    %cst_2 = arith.constant dense<0.000000e+00> : vector<8xf32>
    %5 = vector.multi_reduction <add>, %4, %cst_2 [1] : vector<8x32xf32> to vector<8xf32>
    %6 = arith.mulf %1, %1 : vector<8x32xf32>
    %cst_3 = arith.constant dense<0.000000e+00> : vector<8xf32>
    %7 = vector.multi_reduction <add>, %6, %cst_3 [1] : vector<8x32xf32> to vector<8xf32>
    %8 = arith.mulf %5, %7 : vector<8xf32>
    %cst_4 = arith.constant 1.000000e-16 : f32
    %9 = vector.broadcast %cst_4 : f32 to vector<8xf32>
    %10 = arith.maximumf %8, %9 : vector<8xf32>
    %11 = math.rsqrt %10 : vector<8xf32>
    %12 = arith.mulf %3, %11 : vector<8xf32>
    %13 = vector.shape_cast %12 : vector<8xf32> to vector<1x8xf32>
    %c0_5 = arith.constant 0 : index
    %c0_6 = arith.constant 0 : index
    %14 = vector.load %arg2[%c0_5, %c0_6] : memref<1x8xf32, #tpu.memory_space<vmem>>, vector<1x8xf32>
    tpu.vector_store %arg2[%c0_5, %c0_6], %13 {strides = array<i32>} : memref<1x8xf32, #tpu.memory_space<vmem>>, vector<1x8xf32>,
    return
  }
  func.func @transform_0(%arg0: i32) -> (i32, i32) {
    %c0_i32 = arith.constant 0 : i32
    %c0_i32_0 = arith.constant 0 : i32
    return %arg0, %c0_i32 : i32, i32
  }
  func.func @transform_1(%arg0: i32) -> (i32, i32) {
    %c0_i32 = arith.constant 0 : i32
    %c0_i32_0 = arith.constant 0 : i32
    return %c0_i32, %arg0 : i32, i32
  }
}

</mosaic_0001>

<bundles_post_ra>
// kernel: gmn_loss_fast_forward.1
= control target key start
LH: loop header
LB: loop body
LE: loop exit
PB: predicated region body
PF: predicated region fallthrough
CT: control target
= control target key end

     0   :  { %vm15_vm0 = vcmask 261120   ;;  %s113_s0 = inlined_call_operand.vmem [shape: f32[8,64], index: 0, kind: input, shape index: {}]   ;;  %s114_s1 = inlined_call_operand.hbm [shape: f32[1,8], index: 1, kind: output, shape index: {}]  }
   0x1   :  { %v9_v0 = vld [vmem:[%s113_s0] sm:$0xff] }
   0x2   :  { %6 = vsyncpa [#allocation3], 0  ;;  %v19_v1 = vmul.f32 %v9_v0, %v9_v0  ;;  %s86_s8 = smov 96   ;;  %v35_v12 = vlaneseq  ;;  %s87_s0 = smov [#allocation2]   ;;  %vm42_vm1 = vcmask 57344  }
   0x3   :  { %s50_s9 = sshll.u32 %s87_s0, 4  ;;  %s51_s9 = int_to_ptr.vmem [resolvable:$true] %s50_s9 }
   0x4   :  { %24 = vrot.lane.b32.xlu0 %v19_v1, %s86_s8  ;;  %v20_v2 = vsel %vm15_vm0, %v19_v1, 0.0  ;;  %v36_v13 = vand.u32 127, %v35_v12  ;;  %v38_v14 = vshrl.u32 %v35_v12, 7  ;;  %s62_s10 = scalar_lea.vmem %s51_s9, 16  ;;  %s66_s11 = scalar_lea.vmem %s51_s9, 32 }
   0x5   :  { %21 = vadd.xlane.f32.xlu1 %v20_v2  ;;  %p63_p0 = scmp.ne.s32.totalorder %s51_s9, %s62_s10  ;;  %p67_p1 = scmp.lt.s32.totalorder %s51_s9, %s51_s9 }
   0x6   :  { %v39_v16 = vsub.s32 %v36_v13, %v38_v14  ;;  %p68_p2 = scmp.lt.s32.totalorder %s66_s11, %s62_s10 }
   0x8   :  { %11 = vrot.lane.b32.xlu0 %v9_v0, %s86_s8  ;;  %p69_p3 = por %p68_p2, %p67_p1 }
   0xa   :  { %p70_p4 = pnand %p69_p3, %p63_p0 }
  0x76   :  { %v25_v3 = vpop.permute.xlu0 %24 }
  0x77   :  { %v27_v4 = vsel %vm15_vm0, %v25_v3, 0.0 }
  0x78   :  { %28 = vadd.xlane.f32.xlu1 %v27_v4 }
  0x7a   :  { %v12_v5 = vpop.permute.xlu0 %11 }
  0x7b   :  { %v14_v6 = vmul.f32 %v12_v5, %v9_v0 }
  0x7d   :  { %v16_v7 = vsel %vm15_vm0, %v14_v6, 0.0 }
  0x7e   :  { %17 = vadd.xlane.f32.xlu0 %v16_v7 }
  0x92   :  { %v22_v8 = vpop.xlane.xlu1 %21 }
 0x105   :  { %v29_v9 = vpop.xlane.xlu1 %28 }
 0x106   :  { %v30_v10 = vmul.f32 %v29_v9, %v22_v8 }
 0x108   :  { %v31_v11 = vmax.f32 %v30_v10, 1e-16 }
 0x10a   :  { %60 = vrsqrt.f32 %v31_v11 }
 0x10b   :  { %v18_v15 = vpop.xlane.xlu0 %17 }
 0x114   :  { %v61_v17 = vpop.eup %60 }
 0x115   :  { %v33_v18 = vmul.f32 %v61_v17, %v18_v15 }
 0x117   :  { %v40_v19 = vrot.slane %v33_v18, %v39_v16 }
 0x119   :  { %43 = vst.msk [vmem:[#allocation2] sm:$0x1] %vm42_vm1, %v40_v19 }
 0x11a   :  { %73 = shalt.err (!%p70_p4)
}
 0x11b   :  { %s74_s14 = scalar_lea.hbm %s114_s1, 16 }
 0x11c   :  { %p75_p5 = scmp.ne.s32.totalorder %s114_s1, %s74_s14  ;;  %p78_p6 = scmp.lt.u32.totalorder %s74_s14, %s114_s1 }
 0x11e   :  { %p80_p7 = pnand %p78_p6, %p75_p5 }
 0x120   :  { %83 = shalt.err (!%p80_p7)
}
 0x121   :  { %53 = dma.vmem_to_hbm [thread:$0]  %s51_s9, 16, %s114_s1, [#allocation3]  }
 0x122   :  { %84 = dma.done.wait [#allocation3], 16  }
 0x123   :  { %85 = vsyncadd [#allocation3], 4294967280 }
 0x124   :  { %57 = vsyncpa [#allocation3], 1 }

</bundles_post_ra>
